<compile_context>
chip_gen: v7x
topology: tpu7x:2x2x1
jax: 0.10.0
libtpu: 0.0.40
codegen_flags: <defaults>
</compile_context>

<pallas_src>
import jax
import jax.numpy as jnp
from jax.experimental import pallas as pl
from jax.experimental.pallas import tpu as pltpu


def _round_up(a, b):
    return (a + b - 1) // b * b


def _ensemble_matmul_kernel(x_ref, w_ref, b_ref, o_ref):
    """One (TN, Dp) output tile; grid axis 1 reduces over K (=D_in) blocks.

    x_ref : (TN, TK)  bf16   input tile
    w_ref : (TK, Dp)  bf16   ensemble-collapsed, weight- & scale-folded slab
    b_ref : (1,  Dp)  f32    ensemble-collapsed, scale-folded bias
    o_ref : (TN, Dp)  f32    resident across the K axis (same block every k)
    """
    k = pl.program_id(1)

    @pl.when(k == 0)
    def _init():
        # Initialize the resident f32 output tile with the bias: no extra
        # accumulator scratch, no final copy, bias added exactly once.
        o_ref[...] = jnp.broadcast_to(b_ref[...], o_ref.shape)

    # MXU matmul, bf16 operands, f32 accumulation directly into o_ref.
    o_ref[...] += jnp.dot(x_ref[...], w_ref[...],
                          preferred_element_type=jnp.float32)


def model_ensemble_forward(x, w_stack, b_stack, model_weights,
                           reduction_strategy="mean",
                           *, max_tn=512, max_tk=1024):
    """Pallas implementation of ModelEnsemble.forward (synthetic linear heads).

    x             : (N, D_in)        float32   (N = batch * time)
    w_stack       : (M, D_in, D_out) float32   per-model weights
    b_stack       : (M, D_out)       float32   per-model biases
    model_weights : (M,)             float32   ensemble weights
    """
    if reduction_strategy not in ("mean", "sum"):
        raise ValueError(f"Unknown reduction strategy: {reduction_strategy}")

    M, D_in, D_out = w_stack.shape
    N = x.shape[0]

    # --- host-side collapse of the linear ensemble (tiny: M*D_in*D_out) -----
    mw = model_weights.astype(jnp.float32)
    eff = mw / jnp.sum(mw) if reduction_strategy == "mean" else mw
    w_eff = jnp.einsum("m,mio->io", eff, w_stack.astype(jnp.float32))
    b_eff = jnp.einsum("m,mo->o", eff, b_stack.astype(jnp.float32))

    # --- tiling / padding ----------------------------------------------------
    Dp = _round_up(D_out, 128)            # lane-dense output (unmasked stores)

    if N <= max_tn:                        # N (batch*time) tile
        TN = _round_up(N, 8)
        N_pad = TN
    else:
        TN = max_tn
        N_pad = _round_up(N, TN)

    if D_in <= max_tk:                     # K (feature) tile
        TK = D_in
        K_pad = D_in
    else:
        TK = 512
        K_pad = _round_up(D_in, TK)

    x_p = jnp.zeros((N_pad, K_pad), jnp.bfloat16)
    x_p = x_p.at[:N, :D_in].set(x.astype(jnp.bfloat16))
    w_p = jnp.zeros((K_pad, Dp), jnp.bfloat16)
    w_p = w_p.at[:D_in, :D_out].set(w_eff.astype(jnp.bfloat16))
    b_p = jnp.zeros((1, Dp), jnp.float32)
    b_p = b_p.at[0, :D_out].set(b_eff)

    grid = (N_pad // TN, K_pad // TK)

    # VMEM budget: double-buffered bf16 x and W tiles + resident f32 out tile
    # + bias, with headroom. Sized to fit v7x's 64 MiB physical VMEM.
    vmem_bytes = (2 * TN * TK * 2 + 2 * TK * Dp * 2
                  + 2 * TN * Dp * 4 + 2 * Dp * 4 + (1 << 20))
    vmem_limit = int(min(max(vmem_bytes, 4 << 20), 48 << 20))

    out = pl.pallas_call(
        _ensemble_matmul_kernel,
        out_shape=jax.ShapeDtypeStruct((N_pad, Dp), jnp.float32),
        grid_spec=pltpu.PrefetchScalarGridSpec(
            num_scalar_prefetch=0,
            grid=grid,
            in_specs=[
                pl.BlockSpec((TN, TK), lambda i, k: (i, k)),   # x tile
                pl.BlockSpec((TK, Dp), lambda i, k: (k, 0)),   # collapsed W
                pl.BlockSpec((1, Dp), lambda i, k: (0, 0)),    # collapsed bias
            ],
            out_specs=pl.BlockSpec((TN, Dp), lambda i, k: (i, 0)),
        ),
        compiler_params=pltpu.CompilerParams(
            dimension_semantics=("parallel", "arbitrary"),
            vmem_limit_bytes=vmem_limit,
        ),
    )(x_p, w_p, b_p)

    return out[:N, :D_out]


def model_ensemble_reference(x, w_stack, b_stack, model_weights,
                             reduction_strategy="mean"):
    """Mirrors ModelEnsemble._reduce_preds over per-model linear predictions."""
    preds = [x @ w_stack[m] + b_stack[m] for m in range(w_stack.shape[0])]
    result = sum(p * w for p, w in zip(preds, model_weights))
    if reduction_strategy == "mean":
        result = result / jnp.sum(model_weights)
    return result


if __name__ == "__main__":
    key = jax.random.PRNGKey(0)
    k_x, k_w, k_b, k_mw = jax.random.split(key, 4)

    # Small shapes consistent with a time-series ensemble forward pass.
    batch, seq, d_in, d_out = 2, 8, 32, 16
    num_models = 3

    x = jax.random.normal(k_x, (batch * seq, d_in), dtype=jnp.float32)
    w_stack = jax.random.normal(k_w, (num_models, d_in, d_out),
                                dtype=jnp.float32) * 0.1
    b_stack = jax.random.normal(k_b, (num_models, d_out),
                                dtype=jnp.float32) * 0.1
    model_weights = jnp.abs(jax.random.normal(k_mw, (num_models,),
                                              dtype=jnp.float32)) + 0.5

    ok = True
    for strategy in ("mean", "sum"):
        out = model_ensemble_forward(x, w_stack, b_stack, model_weights,
                                     reduction_strategy=strategy)
        out = jax.block_until_ready(out)
        ref = model_ensemble_reference(x, w_stack, b_stack, model_weights,
                                       reduction_strategy=strategy)
        ok &= out.shape == (batch * seq, d_out)
        # bf16 operands / f32 accumulation -> loosened tolerance vs f32 ref.
        ok &= bool(jnp.allclose(out, ref, atol=2e-2, rtol=2e-2))

    assert ok
    print("KERNEL_OK")
</pallas_src>

<mosaic_0001>
module attributes {stable_mosaic.version = 11 : i64} {
  func.func @_ensemble_matmul_kernel(%arg0: i32, %arg1: i32, %arg2: memref<16x32xbf16, #tpu.memory_space<vmem>>, %arg3: memref<32x128xbf16, #tpu.memory_space<vmem>>, %arg4: memref<1x128xf32, #tpu.memory_space<vmem>>, %arg5: memref<16x128xf32, #tpu.memory_space<vmem>>) attributes {dimension_semantics = [#tpu.dimension_semantics<parallel>, #tpu.dimension_semantics<arbitrary>], iteration_bounds = array<i64: 1, 1>, scalar_prefetch = 0 : i64, scratch_operands = 0 : i64, tpu.core_type = #tpu.core_type<tc>, window_params = [{transform_indices = @transform_0, window_bounds = array<i64: 16, 32>}, {transform_indices = @transform_1, window_bounds = array<i64: 32, 128>}, {pipeline_mode = #tpu.pipeline_mode<synchronous>, transform_indices = @transform_2, window_bounds = array<i64: 1, 128>}, {transform_indices = @transform_3, window_bounds = array<i64: 16, 128>}]} {
    %c0_i32 = arith.constant 0 : i32
    %0 = arith.cmpi eq, %arg1, %c0_i32 : i32
    %1 = arith.extui %0 : i1 to i32
    %c0_i32_0 = arith.constant 0 : i32
    %2 = arith.cmpi ne, %1, %c0_i32_0 : i32
    scf.if %2 {
      %c0_8 = arith.constant 0 : index
      %c0_9 = arith.constant 0 : index
      %9 = vector.load %arg4[%c0_8, %c0_9] : memref<1x128xf32, #tpu.memory_space<vmem>>, vector<1x128xf32>
      %10 = vector.shape_cast %9 : vector<1x128xf32> to vector<1x128xf32>
      %11 = vector.broadcast %10 : vector<1x128xf32> to vector<16x128xf32>
      %c0_10 = arith.constant 0 : index
      %c0_11 = arith.constant 0 : index
      %12 = vector.load %arg5[%c0_10, %c0_11] : memref<16x128xf32, #tpu.memory_space<vmem>>, vector<16x128xf32>
      tpu.vector_store %arg5[%c0_10, %c0_11], %11 {strides = array<i32>} : memref<16x128xf32, #tpu.memory_space<vmem>>, vector<16x128xf32>,
    } else {
    }
    %c0 = arith.constant 0 : index
    %c0_1 = arith.constant 0 : index
    %3 = vector.load %arg5[%c0, %c0_1] : memref<16x128xf32, #tpu.memory_space<vmem>>, vector<16x128xf32>
    %c0_2 = arith.constant 0 : index
    %c0_3 = arith.constant 0 : index
    %4 = vector.load %arg2[%c0_2, %c0_3] : memref<16x32xbf16, #tpu.memory_space<vmem>>, vector<16x32xbf16>
    %c0_4 = arith.constant 0 : index
    %c0_5 = arith.constant 0 : index
    %5 = vector.load %arg3[%c0_4, %c0_5] : memref<32x128xbf16, #tpu.memory_space<vmem>>, vector<32x128xbf16>
    %cst = arith.constant dense<0.000000e+00> : vector<16x128xf32>
    %6 = tpu.matmul %4, %5, %cst {dimension_numbers = #tpu.dot_dimension_numbers<[1], [0], [0], [1], [0, 0, 1, 1], [], []>} : vector<16x32xbf16>, vector<32x128xbf16>, vector<16x128xf32> -> vector<16x128xf32>
    %7 = arith.addf %3, %6 : vector<16x128xf32>
    %c0_6 = arith.constant 0 : index
    %c0_7 = arith.constant 0 : index
    %8 = vector.load %arg5[%c0_6, %c0_7] : memref<16x128xf32, #tpu.memory_space<vmem>>, vector<16x128xf32>
    tpu.vector_store %arg5[%c0_6, %c0_7], %7 {strides = array<i32>} : memref<16x128xf32, #tpu.memory_space<vmem>>, vector<16x128xf32>,
    return
  }
  func.func @transform_0(%arg0: i32, %arg1: i32) -> (i32, i32) {
    %c0_i32 = arith.constant 0 : i32
    return %arg0, %arg1 : i32, i32
  }
  func.func @transform_1(%arg0: i32, %arg1: i32) -> (i32, i32) {
    %c0_i32 = arith.constant 0 : i32
    %c0_i32_0 = arith.constant 0 : i32
    return %arg1, %c0_i32 : i32, i32
  }
  func.func @transform_2(%arg0: i32, %arg1: i32) -> (i32, i32) {
    %c0_i32 = arith.constant 0 : i32
    %c0_i32_0 = arith.constant 0 : i32
    %c0_i32_1 = arith.constant 0 : i32
    return %c0_i32, %c0_i32_0 : i32, i32
  }
  func.func @transform_3(%arg0: i32, %arg1: i32) -> (i32, i32) {
    %c0_i32 = arith.constant 0 : i32
    %c0_i32_0 = arith.constant 0 : i32
    return %arg0, %c0_i32 : i32, i32
  }
}

</mosaic_0001>

<bundles_post_ra>
// kernel: tpu_custom_call.1
= control target key start
LH: loop header
LB: loop body
LE: loop exit
PB: predicated region body
PF: predicated region fallthrough
CT: control target
= control target key end

     0   :  { %8 = vsyncpa [#allocation3], 0  ;;  %s317_s0 = inlined_call_operand.hbm [shape: bf16[16,32], index: 0, kind: input, shape index: {}]   ;;  %s318_s1 = inlined_call_operand.hbm [shape: bf16[32,128], index: 1, kind: input, shape index: {}]   ;;  %s319_s2 = inlined_call_operand.vmem [shape: f32[1,128], index: 2, kind: input, shape index: {}]   ;;  %s320_s3 = inlined_call_operand.hbm [shape: f32[16,128], index: 3, kind: output, shape index: {}]  }
   0x1   :  { %9 = vsyncpa [#allocation6], 0 }
   0x2   :  { %10 = vsyncpa [#allocation4], 0  ;;  %s249_s12 = smov [#allocation2]   ;;  %s177_s16 = scalar_lea.hbm %s317_s0, 128 }
   0x3   :  { %s16_s13 = sshll.u32 %s249_s12, 4  ;;  %p178_p0 = scmp.ne.s32.totalorder %s317_s0, %s177_s16  ;;  %s17_s13 = int_to_ptr.vmem [resolvable:$true] %s16_s13 }
   0x4   :  { %p181_p1 = scmp.lt.u32.totalorder %s177_s16, %s317_s0 }
   0x6   :  { %p183_p2 = pnand %p181_p1, %p178_p0 }
   0x8   :  { %186 = shalt.err (!%p183_p2)
}
   0x9   :  { %s187_s21 = scalar_lea.vmem %s17_s13, 128  ;;  %p192_p4 = scmp.lt.s32.totalorder %s17_s13, %s17_s13 }
   0xa   :  { %p188_p3 = scmp.ne.s32.totalorder %s17_s13, %s187_s21  ;;  %p193_p5 = scmp.lt.s32.totalorder %s187_s21, %s187_s21 }
   0xc   :  { %p194_p6 = por %p193_p5, %p192_p4 }
   0xe   :  { %p195_p7 = pnand %p194_p6, %p188_p3 }
  0x10   :  { %198 = shalt.err (!%p195_p7)
}
  0x11   :  { %s250_s22 = smov 64   ;;  %s251_s23 = smov 4  }
  0x12   :  { %22 = dma.hbm_to_vmem [thread:$0]  %s317_s0, 128, %s17_s13, [#allocation3], %s250_s22, %s250_s22, %s251_s23  }
  0x13   :  { %s252_s26 = smov [#allocation5]   ;;  %s199_s30 = scalar_lea.hbm %s318_s1, 256 }
  0x14   :  { %s28_s27 = sshll.u32 %s252_s26, 4  ;;  %p200_p8 = scmp.ne.s32.totalorder %s318_s1, %s199_s30  ;;  %s29_s27 = int_to_ptr.vmem [resolvable:$true] %s28_s27 }
  0x15   :  { %p203_p9 = scmp.lt.u32.totalorder %s199_s30, %s318_s1 }
  0x17   :  { %p205_p10 = pnand %p203_p9, %p200_p8 }
  0x19   :  { %208 = shalt.err (!%p205_p10)
}
  0x1a   :  { %s209_s8 = scalar_lea.vmem %s29_s27, 256  ;;  %p214_p12 = scmp.lt.s32.totalorder %s29_s27, %s29_s27 }
  0x1b   :  { %p210_p11 = scmp.ne.s32.totalorder %s29_s27, %s209_s8  ;;  %p215_p13 = scmp.lt.s32.totalorder %s209_s8, %s209_s8 }
  0x1d   :  { %p216_p0 = por %p215_p13, %p214_p12 }
  0x1f   :  { %p217_p1 = pnand %p216_p0, %p210_p11 }
  0x21   :  { %220 = shalt.err (!%p217_p1)
}
  0x22   :  { %34 = dma.hbm_to_vmem [thread:$0]  %s318_s1, 256, %s29_s27, [#allocation6], %s250_s22, %s250_s22, %s251_s23  }
  0x23   :  { %243 = dma.done.wait [#allocation3], 128  }
  0x24   :  { %244 = vsyncadd [#allocation3], 4294967168 }
  0x25   :  { %245 = dma.done.wait [#allocation6], 256  }
  0x26   :  { %246 = vsyncadd [#allocation6], 4294967040  ;;  %v253_v0 = vmov 0.0   ;;  %vm254_vm0 = vmmov 0   ;;  %v174_v1 = vld [vmem:[#allocation5] sm:$0xff]   ;;  %v175_v2 = vld [vmem:[#allocation5 + $0x8] sm:$0xff]  }
  0x27   :  { %157 = vmatprep.subr.bf16.mxu0 %v253_v0  ;;  %161 = vmatprep.mubr.msk.bf16.mxu0 %vm254_vm0, %v253_v0  ;;  %v176_v3 = vld [vmem:[#allocation2] sm:$0xff]   ;;  %vm82_vm1 = vcmask 261120   ;;  %s255_s1 = smov [#allocation7]  }
  0x28   :  { %158 = vmatpush3.bf16.msra.mxu0 %v174_v1  ;;  %v149_v4 = vld [vmem:[%s319_s2] ss:$0 sm:$0xff]  ;;  %s136_s12 = sshll.u32 %s255_s1, 4  ;;  %s137_s12 = int_to_ptr.vmem [resolvable:$true] %s136_s12 }
  0x29   :  { %159 = vmatprep.subr.bf16.mxu0 %v253_v0  ;;  %s221_s13 = scalar_lea.vmem %s137_s12, 256  ;;  %p226_p3 = scmp.lt.s32.totalorder %s137_s12, %s137_s12 }
  0x2a   :  { %p222_p2 = scmp.ne.s32.totalorder %s137_s12, %s221_s13  ;;  %p227_p4 = scmp.lt.s32.totalorder %s221_s13, %s221_s13 }
  0x2c   :  { %160 = vmatpush3.bf16.msra.mxu0 %v175_v2  ;;  %p228_p5 = por %p227_p4, %p226_p3 }
  0x2e   :  { %p229_p6 = pnand %p228_p5, %p222_p2 }
  0x2f   :  { %162 = vmatmul.mubr.msk.bf16.vlgmr.msra.gmra.mrb[0].mxu0 %vm82_vm1, %v176_v3 }
 0x102   :  { %v120_v5 = vpop.f32.mrb[0].mxu0 }
 0x103   :  { %v127_v6 = vadd.f32 %v149_v4, %v120_v5  ;;  %v163_v7 = vpop.f32.mrb[1].mxu0 }
 0x104   :  { %v123_v8 = vpop.f32.mrb[2].mxu0 }
 0x105   :  { %129 = vst [vmem:[#allocation7] sm:$0xff] %v127_v6  ;;  %v128_v9 = vadd.f32 %v149_v4, %v123_v8  ;;  %v164_v10 = vpop.f32.mrb[3].mxu0 }
 0x107   :  { %130 = vst [vmem:[#allocation7 + $0x8] sm:$0xff] %v128_v9 }
 0x108   :  { %232 = shalt.err (!%p229_p6)
}
 0x109   :  { %s233_s15 = scalar_lea.hbm %s320_s3, 256 }
 0x10a   :  { %p234_p7 = scmp.ne.s32.totalorder %s320_s3, %s233_s15  ;;  %p237_p8 = scmp.lt.u32.totalorder %s233_s15, %s320_s3 }
 0x10c   :  { %p239_p9 = pnand %p237_p8, %p234_p7 }
 0x10e   :  { %242 = shalt.err (!%p239_p9)
}
 0x10f   :  { %s256_s20 = smov 128   ;;  %s257_s21 = smov 8  }
 0x110   :  { %142 = dma.vmem_to_hbm [thread:$0]  %s137_s12, 256, %s320_s3, [#allocation4], %s256_s20, %s256_s20, %s257_s21  }
 0x111   :  { %247 = dma.done.wait [#allocation4], 256  }
 0x112   :  { %248 = vsyncadd [#allocation4], 4294967040 }
 0x113   :  { %146 = vsyncpa [#allocation3], 1 }
 0x114   :  { %147 = vsyncpa [#allocation6], 1 }
 0x115   :  { %148 = vsyncpa [#allocation4], 1 }

</bundles_post_ra>
